<compile_context>
chip_gen: v7x
topology: tpu7x:2x2x1
jax: 0.10.0
libtpu: 0.0.40
codegen_flags: <defaults>
</compile_context>

<pallas_src>
import functools

import numpy as np
import jax
import jax.numpy as jnp
from jax import lax
from jax.experimental import pallas as pl
from jax.experimental.pallas import tpu as pltpu

_BN_EPS = 1e-5
_LANE = 128
_SUBLANE = 8


def _round_up(x, m):
    return ((x + m - 1) // m) * m


# --------------------------------------------------------------------------
# Fused Pallas kernel
# --------------------------------------------------------------------------
def _make_fused_kernel(layout, t_scale):
    """Kernel over one batch tile.

    Refs: t [Bt,1], x [Bt,in_pad], w_slab [R,Wmax], out [Bt,out_pad].
    `layout` is a static tuple: hidden layers as
    ("hidden", wx_off, in_pad, tb_off, out_pad) and the final layer as
    ("final", w_off, in_pad, b_off, out_pad).  All offsets are multiples of 8
    and all widths are multiples of 128 -> every slice is a tile-aligned view.
    """
    n_hidden = len(layout) - 1

    def kernel(t_ref, x_ref, w_ref, out_ref):
        # Time embedding: swish([sin(t*scale), cos(t*scale)]) -> es, ec.
        args = t_ref[...] * t_scale                      # [Bt, 1]
        s = jnp.sin(args)
        c = jnp.cos(args)
        es = s * (1.0 / (1.0 + jnp.exp(-s)))
        ec = c * (1.0 / (1.0 + jnp.exp(-c)))

        # Basis [es, ec, 1, 0, 0, 0, 0, 0] of shape [Bt, 8]; the per-layer
        # (wt0, wt1, bias) rows live in an (8, Dout) block of the slab, so the
        # time-embed + bias term is one tiny MXU dot instead of XLU row
        # slices/broadcasts.
        bt = t_ref.shape[0]
        lane = lax.broadcasted_iota(jnp.int32, (bt, _SUBLANE), 1)
        one = jnp.ones_like(es)
        zero = jnp.zeros_like(es)
        basis = jnp.where(lane == 0, es,
                          jnp.where(lane == 1, ec,
                                    jnp.where(lane == 2, one, zero)))

        wdt = w_ref.dtype                                # f32 (or bf16 option)
        basis_w = basis.astype(wdt)

        h = x_ref[...]                                   # [Bt, in_pad], f32
        for li in range(n_hidden):
            _, wx_off, din_pad, tb_off, out_pad = layout[li]
            wx = w_ref[wx_off:wx_off + din_pad, :out_pad]
            tb = w_ref[tb_off:tb_off + _SUBLANE, :out_pad]
            z = jnp.dot(h.astype(wdt), wx, preferred_element_type=jnp.float32)
            z = z + jnp.dot(basis_w, tb, preferred_element_type=jnp.float32)
            h = jnp.maximum(z, 0.0)      # BN already folded; dropout = eval

        _, w_off, din_pad, b_off, out_pad = layout[-1]
        w = w_ref[w_off:w_off + din_pad, :out_pad]
        b = w_ref[b_off:b_off + _SUBLANE, :out_pad]       # bias in row 2
        out = jnp.dot(h.astype(wdt), w, preferred_element_type=jnp.float32)
        out = out + jnp.dot(basis_w, b, preferred_element_type=jnp.float32)
        out_ref[...] = out.astype(out_ref.dtype)

    return kernel


# --------------------------------------------------------------------------
# Parameter prep: fold BN + time-embed Linear, dedupe/pack tasks, build slab
# --------------------------------------------------------------------------
def _fold_hidden(p):
    """Fold eval-mode BN and the time-embedder into the linear weights."""
    scale = p["gamma"] / jnp.sqrt(p["var"] + _BN_EPS)            # (1, Dout)
    wx = p["wx"] * scale                                          # (Din, Dout)
    we = p["we"] * scale                                          # (E, Dout)
    wt = p["wte"] @ we                                            # (2, Dout)
    b = (p["b"] - p["mean"]) * scale + p["beta"] + p["bte"] @ we  # (1, Dout)
    return wx, wt, b


def _block_diag(mats):
    assert all(m.shape == mats[0].shape for m in mats), \
        "per-task layer shapes must match for block-diagonal packing"
    rows = sum(m.shape[0] for m in mats)
    cols = sum(m.shape[1] for m in mats)
    out = jnp.zeros((rows, cols), mats[0].dtype)
    r = c = 0
    for m in mats:
        out = out.at[r:r + m.shape[0], c:c + m.shape[1]].set(m)
        r += m.shape[0]
        c += m.shape[1]
    return out


def pack_params(params, shared_layers, num_tasks, input_dim,
                dtype=jnp.float32):
    """Fold BN/time-embed, dedupe shared prefix, pack tasks, build ONE slab.

    Returns (slab, layout, diverged, out_real).
    """
    n_layers = len(shared_layers)

    # Pass 1: per-layer packed matrices at real (unpadded) sizes.
    blocks = []
    diverged = False
    for i in range(n_layers):
        is_final = i == n_layers - 1
        shared = shared_layers[i]
        copies = params[i]
        get = (lambda o: copies[0]) if shared else (lambda o: copies[o])

        if is_final:
            if (not diverged) and shared:
                w, b = get(0)["w"], get(0)["b"]
            elif not diverged:                       # divergence at final layer
                w = jnp.concatenate([get(o)["w"] for o in range(num_tasks)], 1)
                b = jnp.concatenate([get(o)["b"] for o in range(num_tasks)], 1)
                diverged = True
            else:
                w = _block_diag([get(o)["w"] for o in range(num_tasks)])
                b = jnp.concatenate([get(o)["b"] for o in range(num_tasks)], 1)
            blocks.append(("final", w, b))
        else:
            if (not diverged) and shared:
                wx, wt, b = _fold_hidden(get(0))
            elif not diverged:                       # first diverging layer
                parts = [_fold_hidden(get(o)) for o in range(num_tasks)]
                wx = jnp.concatenate([p[0] for p in parts], axis=1)
                wt = jnp.concatenate([p[1] for p in parts], axis=1)
                b = jnp.concatenate([p[2] for p in parts], axis=1)
                diverged = True
            else:
                parts = [_fold_hidden(get(o)) for o in range(num_tasks)]
                wx = _block_diag([p[0] for p in parts])
                wt = jnp.concatenate([p[1] for p in parts], axis=1)
                b = jnp.concatenate([p[2] for p in parts], axis=1)
            blocks.append(("hidden", wx, wt, b))

    # Pass 2: pad & place everything into one lane/sublane-aligned slab.
    in_pad = _round_up(input_dim, _LANE)
    row = 0
    slab_w = _LANE
    layout = []
    placements = []        # (row_off, array)
    out_real = None
    for kind, *arrs in blocks:
        if kind == "hidden":
            wx, wt, b = arrs
            din, dout = wx.shape
            assert din <= in_pad
            dout_pad = _round_up(dout, _LANE)
            wx_off = row
            placements.append((row, wx))
            row += in_pad                      # zero rows cover padded inputs
            tb_off = row
            placements.append((row, wt))       # rows 0,1 of the 8-row block
            placements.append((row + 2, b))    # row 2: bias (basis col 2 = 1)
            row += _SUBLANE
            layout.append(("hidden", wx_off, in_pad, tb_off, dout_pad))
            slab_w = max(slab_w, dout_pad)
            in_pad = dout_pad
        else:
            w, b = arrs
            din, dout = w.shape
            assert din <= in_pad
            dout_pad = _round_up(dout, _LANE)
            w_off = row
            placements.append((row, w))
            row += in_pad
            b_off = row
            placements.append((row + 2, b))    # row 2: bias (basis col 2 = 1)
            row += _SUBLANE
            layout.append(("final", w_off, in_pad, b_off, dout_pad))
            slab_w = max(slab_w, dout_pad)
            out_real = dout

    total_rows = _round_up(row, _SUBLANE)
    slab = jnp.zeros((total_rows, slab_w), jnp.float32)
    for r, a in placements:
        slab = slab.at[r:r + a.shape[0], :a.shape[1]].set(
            a.astype(jnp.float32))
    slab = slab.astype(dtype)
    return slab, tuple(layout), diverged, out_real


# --------------------------------------------------------------------------
# Forward pass (single jitted dispatch around one pallas_call)
# --------------------------------------------------------------------------
@functools.partial(
    jax.jit,
    static_argnames=("layout", "num_tasks", "t_limit", "diverged", "out_real",
                     "batch_tile"))
def forward(slab, xt, t, *, layout, num_tasks, t_limit, diverged, out_real,
            batch_tile=256):
    """Fused forward; returns [B, num_tasks, D] (matches torch eval forward)."""
    B, din = xt.shape
    in_pad = layout[0][2]     # padded input feature width (lane multiple)
    out_pad = layout[-1][4]   # padded output width (lane multiple)

    # Batch padding / tile choice.  batch_tile=256 suits v6e/v7x MXU height
    # (use 128 on v5e); resident VMEM stays far under v7x's 64 MiB.
    b0 = max(_SUBLANE, _round_up(B, _SUBLANE))
    bt = min(batch_tile, b0)
    b_pad = _round_up(b0, bt)

    x = jnp.zeros((b_pad, in_pad), jnp.float32)
    x = x.at[:B, :din].set(xt.astype(jnp.float32))
    tt = jnp.zeros((b_pad, 1), jnp.float32)
    tt = tt.at[:B, 0].set(t.astype(jnp.float32))

    kernel = _make_fused_kernel(layout, float(np.pi / 2.0 / t_limit))

    out = pl.pallas_call(
        kernel,
        out_shape=jax.ShapeDtypeStruct((b_pad, out_pad), jnp.float32),
        grid_spec=pltpu.PrefetchScalarGridSpec(
            num_scalar_prefetch=0,
            grid=(b_pad // bt,),
            in_specs=[
                pl.BlockSpec((bt, 1), lambda i: (i, 0),
                             memory_space=pltpu.MemorySpace.VMEM),
                pl.BlockSpec((bt, in_pad), lambda i: (i, 0),
                             memory_space=pltpu.MemorySpace.VMEM),
                pl.BlockSpec(slab.shape, lambda i: (0, 0),
                             memory_space=pltpu.MemorySpace.VMEM),
            ],
            out_specs=pl.BlockSpec((bt, out_pad), lambda i: (i, 0),
                                   memory_space=pltpu.MemorySpace.VMEM),
        ),
        compiler_params=pltpu.CompilerParams(
            dimension_semantics=("parallel",)),
    )(tt, x, slab)

    out = out[:B, :out_real]
    if diverged:
        return out.reshape(B, num_tasks, out_real // num_tasks)
    return jnp.broadcast_to(out[:, None, :], (B, num_tasks, out_real))


# --------------------------------------------------------------------------
# Pure-JAX reference mirroring the torch module (eval mode)
# --------------------------------------------------------------------------
def _time_embed(t, t_limit):
    args = (t[:, None] / t_limit) * (np.pi / 2)
    e = jnp.concatenate([jnp.sin(args), jnp.cos(args)], axis=1)
    return e * jax.nn.sigmoid(e)  # swish


def forward_ref(params, shared_layers, num_tasks, t_limit, xt, t):
    n_layers = len(shared_layers)
    temb = _time_embed(t, t_limit)
    outs = [xt] * num_tasks
    for i in range(n_layers):
        shared = shared_layers[i]
        new = []
        for o in range(num_tasks):
            p = params[i][0 if shared else o]
            x = outs[o]
            if i < n_layers - 1:
                e = temb @ p["wte"] + p["bte"]
                w = jnp.concatenate([p["wx"], p["we"]], axis=0)
                z = jnp.concatenate([x, e], axis=1) @ w + p["b"]
                y = (z - p["mean"]) / jnp.sqrt(p["var"] + _BN_EPS) * p["gamma"] \
                    + p["beta"]
                new.append(jnp.maximum(y, 0.0))
            else:
                new.append(x @ p["w"] + p["b"])
        outs = new
    return jnp.stack(outs, axis=1)


# --------------------------------------------------------------------------
# Parameter construction (deterministic, synthetic)
# --------------------------------------------------------------------------
def init_params(key, num_tasks, input_dim, enc_dims, dec_dims,
                shared_layers, time_embed_size):
    hidden_dims = enc_dims + dec_dims[::-1]
    n_layers = len(shared_layers)
    assert n_layers == len(enc_dims) + len(dec_dims) + 1
    layers = []
    for i in range(n_layers):
        if i == 0:
            in_size, out_size = input_dim, hidden_dims[i]
        elif i < n_layers - 1:
            in_size, out_size = hidden_dims[i - 1], hidden_dims[i]
        else:
            in_size, out_size = hidden_dims[i - 1], input_dim
        n_copies = 1 if shared_layers[i] else num_tasks
        per_task = []
        for _ in range(n_copies):
            key, *ks = jax.random.split(key, 10)
            if i < n_layers - 1:
                p = {
                    "wx": 0.05 * jax.random.normal(ks[0], (in_size, out_size), jnp.float32),
                    "we": 0.05 * jax.random.normal(ks[1], (time_embed_size, out_size), jnp.float32),
                    "b": 0.05 * jax.random.normal(ks[2], (1, out_size), jnp.float32),
                    "gamma": 1.0 + 0.1 * jax.random.normal(ks[3], (1, out_size), jnp.float32),
                    "beta": 0.1 * jax.random.normal(ks[4], (1, out_size), jnp.float32),
                    "mean": 0.1 * jax.random.normal(ks[5], (1, out_size), jnp.float32),
                    "var": 1.0 + 0.1 * jnp.abs(jax.random.normal(ks[6], (1, out_size), jnp.float32)),
                    "wte": 0.5 * jax.random.normal(ks[7], (2, time_embed_size), jnp.float32),
                    "bte": 0.1 * jax.random.normal(ks[8], (1, time_embed_size), jnp.float32),
                }
            else:
                p = {
                    "w": 0.05 * jax.random.normal(ks[0], (in_size, out_size), jnp.float32),
                    "b": 0.05 * jax.random.normal(ks[1], (1, out_size), jnp.float32),
                }
            per_task.append(p)
        layers.append(per_task)
    return layers


# --------------------------------------------------------------------------
if __name__ == "__main__":
    # Small shapes consistent with the module's forward.
    B = 8                 # batch
    num_tasks = 3         # T
    input_dim = 64        # D
    enc_dims = [64, 32, 16]
    dec_dims = [32, 64]
    shared_layers = [True, True, True, False, False, False]
    time_embed_size = 16
    t_limit = 1.0

    key = jax.random.PRNGKey(0)
    k_param, k_x, k_t = jax.random.split(key, 3)

    params = init_params(k_param, num_tasks, input_dim, enc_dims, dec_dims,
                         shared_layers, time_embed_size)
    xt = jax.random.normal(k_x, (B, input_dim), jnp.float32)
    t = jax.random.uniform(k_t, (B,), jnp.float32)

    # One-time parameter prep: BN + time-embed fold, task packing/dedup, and
    # packing into a single lane/sublane-aligned VMEM slab.
    # (dtype=jnp.bfloat16 here halves MXU passes / weight DMA on v6e/v7x.)
    slab, layout, diverged, out_real = pack_params(
        params, shared_layers, num_tasks, input_dim, dtype=jnp.float32)
    slab = jax.block_until_ready(slab)

    out = forward(slab, xt, t, layout=layout, num_tasks=num_tasks,
                  t_limit=t_limit, diverged=diverged, out_real=out_real,
                  batch_tile=256)
    out = jax.block_until_ready(out)
    assert out.shape == (B, num_tasks, input_dim)

    ref = jax.block_until_ready(
        forward_ref(params, shared_layers, num_tasks, t_limit, xt, t))
    np.testing.assert_allclose(np.asarray(out), np.asarray(ref),
                               rtol=1e-4, atol=1e-4)

    print("KERNEL_OK")
</pallas_src>

<mosaic_0001>
module attributes {stable_mosaic.version = 11 : i64} {
  func.func @kernel(%arg0: i32, %arg1: memref<8x1xf32, #tpu.memory_space<vmem>>, %arg2: memref<8x128xf32, #tpu.memory_space<vmem>>, %arg3: memref<944x256xf32, #tpu.memory_space<vmem>>, %arg4: memref<8x256xf32, #tpu.memory_space<vmem>>) attributes {dimension_semantics = [#tpu.dimension_semantics<parallel>], iteration_bounds = array<i64: 1>, scalar_prefetch = 0 : i64, scratch_operands = 0 : i64, tpu.core_type = #tpu.core_type<tc>, window_params = [{transform_indices = @transform_0, window_bounds = array<i64: 8, 1>}, {transform_indices = @transform_1, window_bounds = array<i64: 8, 128>}, {pipeline_mode = #tpu.pipeline_mode<synchronous>, transform_indices = @transform_2, window_bounds = array<i64: 944, 256>}, {transform_indices = @transform_3, window_bounds = array<i64: 8, 256>}]} {
    %c0 = arith.constant 0 : index
    %c0_0 = arith.constant 0 : index
    %0 = vector.load %arg1[%c0, %c0_0] : memref<8x1xf32, #tpu.memory_space<vmem>>, vector<8x1xf32>
    %cst = arith.constant 1.57079637 : f32
    %1 = vector.broadcast %cst : f32 to vector<8x1xf32>
    %2 = arith.mulf %0, %1 : vector<8x1xf32>
    %3 = math.sin %2 : vector<8x1xf32>
    %4 = math.cos %2 : vector<8x1xf32>
    %cst_1 = arith.constant 0.000000e+00 : f32
    %5 = vector.broadcast %cst_1 : f32 to vector<8x1xf32>
    %6 = arith.subf %5, %3 : vector<8x1xf32>
    %7 = math.exp %6 : vector<8x1xf32>
    %cst_2 = arith.constant 1.000000e+00 : f32
    %8 = vector.broadcast %cst_2 : f32 to vector<8x1xf32>
    %9 = arith.addf %8, %7 : vector<8x1xf32>
    %cst_3 = arith.constant 1.000000e+00 : f32
    %10 = vector.broadcast %cst_3 : f32 to vector<8x1xf32>
    %11 = arith.divf %10, %9 : vector<8x1xf32>
    %12 = arith.mulf %3, %11 : vector<8x1xf32>
    %cst_4 = arith.constant 0.000000e+00 : f32
    %13 = vector.broadcast %cst_4 : f32 to vector<8x1xf32>
    %14 = arith.subf %13, %4 : vector<8x1xf32>
    %15 = math.exp %14 : vector<8x1xf32>
    %cst_5 = arith.constant 1.000000e+00 : f32
    %16 = vector.broadcast %cst_5 : f32 to vector<8x1xf32>
    %17 = arith.addf %16, %15 : vector<8x1xf32>
    %cst_6 = arith.constant 1.000000e+00 : f32
    %18 = vector.broadcast %cst_6 : f32 to vector<8x1xf32>
    %19 = arith.divf %18, %17 : vector<8x1xf32>
    %20 = arith.mulf %4, %19 : vector<8x1xf32>
    %21 = tpu.iota {dimensions = array<i32: 1>} : vector<8x8xi32>
    %cst_7 = arith.constant 1.000000e+00 : f32
    %22 = vector.broadcast %cst_7 : f32 to vector<8x1xf32>
    %cst_8 = arith.constant 0.000000e+00 : f32
    %23 = vector.broadcast %cst_8 : f32 to vector<8x1xf32>
    %c0_i32 = arith.constant 0 : i32
    %24 = vector.broadcast %c0_i32 : i32 to vector<8x8xi32>
    %25 = arith.cmpi eq, %21, %24 : vector<8x8xi32>
    %c1_i32 = arith.constant 1 : i32
    %26 = vector.broadcast %c1_i32 : i32 to vector<8x8xi32>
    %27 = arith.cmpi eq, %21, %26 : vector<8x8xi32>
    %c2_i32 = arith.constant 2 : i32
    %28 = vector.broadcast %c2_i32 : i32 to vector<8x8xi32>
    %29 = arith.cmpi eq, %21, %28 : vector<8x8xi32>
    %30 = vector.shape_cast %22 : vector<8x1xf32> to vector<8x1xf32>
    %31 = vector.broadcast %30 : vector<8x1xf32> to vector<8x8xf32>
    %32 = vector.shape_cast %23 : vector<8x1xf32> to vector<8x1xf32>
    %33 = vector.broadcast %32 : vector<8x1xf32> to vector<8x8xf32>
    %34 = arith.select %29, %31, %33 : vector<8x8xi1>, vector<8x8xf32>
    %35 = vector.shape_cast %20 : vector<8x1xf32> to vector<8x1xf32>
    %36 = vector.broadcast %35 : vector<8x1xf32> to vector<8x8xf32>
    %37 = arith.select %27, %36, %34 : vector<8x8xi1>, vector<8x8xf32>
    %38 = vector.shape_cast %12 : vector<8x1xf32> to vector<8x1xf32>
    %39 = vector.broadcast %38 : vector<8x1xf32> to vector<8x8xf32>
    %40 = arith.select %25, %39, %37 : vector<8x8xi1>, vector<8x8xf32>
    %c0_9 = arith.constant 0 : index
    %c0_10 = arith.constant 0 : index
    %41 = vector.load %arg2[%c0_9, %c0_10] : memref<8x128xf32, #tpu.memory_space<vmem>>, vector<8x128xf32>
    %c0_11 = arith.constant 0 : index
    %c0_12 = arith.constant 0 : index
    %42 = vector.load %arg3[%c0_11, %c0_12] : memref<944x256xf32, #tpu.memory_space<vmem>>, vector<128x128xf32>
    %c128 = arith.constant 128 : index
    %c0_13 = arith.constant 0 : index
    %43 = vector.load %arg3[%c128, %c0_13] : memref<944x256xf32, #tpu.memory_space<vmem>>, vector<8x128xf32>
    %cst_14 = arith.constant dense<0.000000e+00> : vector<8x128xf32>
    %44 = tpu.matmul %41, %42, %cst_14 {dimension_numbers = #tpu.dot_dimension_numbers<[1], [0], [0], [1], [0, 0, 1, 1], [], []>} : vector<8x128xf32>, vector<128x128xf32>, vector<8x128xf32> -> vector<8x128xf32>
    %cst_15 = arith.constant dense<0.000000e+00> : vector<8x128xf32>
    %45 = tpu.matmul %40, %43, %cst_15 {dimension_numbers = #tpu.dot_dimension_numbers<[1], [0], [0], [1], [0, 0, 1, 1], [], []>} : vector<8x8xf32>, vector<8x128xf32>, vector<8x128xf32> -> vector<8x128xf32>
    %46 = arith.addf %44, %45 : vector<8x128xf32>
    %cst_16 = arith.constant 0.000000e+00 : f32
    %47 = vector.broadcast %cst_16 : f32 to vector<8x128xf32>
    %48 = arith.maximumf %46, %47 : vector<8x128xf32>
    %c136 = arith.constant 136 : index
    %c0_17 = arith.constant 0 : index
    %49 = vector.load %arg3[%c136, %c0_17] : memref<944x256xf32, #tpu.memory_space<vmem>>, vector<128x128xf32>
    %c264 = arith.constant 264 : index
    %c0_18 = arith.constant 0 : index
    %50 = vector.load %arg3[%c264, %c0_18] : memref<944x256xf32, #tpu.memory_space<vmem>>, vector<8x128xf32>
    %cst_19 = arith.constant dense<0.000000e+00> : vector<8x128xf32>
    %51 = tpu.matmul %48, %49, %cst_19 {dimension_numbers = #tpu.dot_dimension_numbers<[1], [0], [0], [1], [0, 0, 1, 1], [], []>} : vector<8x128xf32>, vector<128x128xf32>, vector<8x128xf32> -> vector<8x128xf32>
    %cst_20 = arith.constant dense<0.000000e+00> : vector<8x128xf32>
    %52 = tpu.matmul %40, %50, %cst_20 {dimension_numbers = #tpu.dot_dimension_numbers<[1], [0], [0], [1], [0, 0, 1, 1], [], []>} : vector<8x8xf32>, vector<8x128xf32>, vector<8x128xf32> -> vector<8x128xf32>
    %53 = arith.addf %51, %52 : vector<8x128xf32>
    %cst_21 = arith.constant 0.000000e+00 : f32
    %54 = vector.broadcast %cst_21 : f32 to vector<8x128xf32>
    %55 = arith.maximumf %53, %54 : vector<8x128xf32>
    %c272 = arith.constant 272 : index
    %c0_22 = arith.constant 0 : index
    %56 = vector.load %arg3[%c272, %c0_22] : memref<944x256xf32, #tpu.memory_space<vmem>>, vector<128x128xf32>
    %c400 = arith.constant 400 : index
    %c0_23 = arith.constant 0 : index
    %57 = vector.load %arg3[%c400, %c0_23] : memref<944x256xf32, #tpu.memory_space<vmem>>, vector<8x128xf32>
    %cst_24 = arith.constant dense<0.000000e+00> : vector<8x128xf32>
    %58 = tpu.matmul %55, %56, %cst_24 {dimension_numbers = #tpu.dot_dimension_numbers<[1], [0], [0], [1], [0, 0, 1, 1], [], []>} : vector<8x128xf32>, vector<128x128xf32>, vector<8x128xf32> -> vector<8x128xf32>
    %cst_25 = arith.constant dense<0.000000e+00> : vector<8x128xf32>
    %59 = tpu.matmul %40, %57, %cst_25 {dimension_numbers = #tpu.dot_dimension_numbers<[1], [0], [0], [1], [0, 0, 1, 1], [], []>} : vector<8x8xf32>, vector<8x128xf32>, vector<8x128xf32> -> vector<8x128xf32>
    %60 = arith.addf %58, %59 : vector<8x128xf32>
    %cst_26 = arith.constant 0.000000e+00 : f32
    %61 = vector.broadcast %cst_26 : f32 to vector<8x128xf32>
    %62 = arith.maximumf %60, %61 : vector<8x128xf32>
    %c408 = arith.constant 408 : index
    %c0_27 = arith.constant 0 : index
    %63 = vector.load %arg3[%c408, %c0_27] : memref<944x256xf32, #tpu.memory_space<vmem>>, vector<128x256xf32>
    %c536 = arith.constant 536 : index
    %c0_28 = arith.constant 0 : index
    %64 = vector.load %arg3[%c536, %c0_28] : memref<944x256xf32, #tpu.memory_space<vmem>>, vector<8x256xf32>
    %cst_29 = arith.constant dense<0.000000e+00> : vector<8x256xf32>
    %65 = tpu.matmul %62, %63, %cst_29 {dimension_numbers = #tpu.dot_dimension_numbers<[1], [0], [0], [1], [0, 0, 1, 1], [], []>} : vector<8x128xf32>, vector<128x256xf32>, vector<8x256xf32> -> vector<8x256xf32>
    %cst_30 = arith.constant dense<0.000000e+00> : vector<8x256xf32>
    %66 = tpu.matmul %40, %64, %cst_30 {dimension_numbers = #tpu.dot_dimension_numbers<[1], [0], [0], [1], [0, 0, 1, 1], [], []>} : vector<8x8xf32>, vector<8x256xf32>, vector<8x256xf32> -> vector<8x256xf32>
    %67 = arith.addf %65, %66 : vector<8x256xf32>
    %cst_31 = arith.constant 0.000000e+00 : f32
    %68 = vector.broadcast %cst_31 : f32 to vector<8x256xf32>
    %69 = arith.maximumf %67, %68 : vector<8x256xf32>
    %c544 = arith.constant 544 : index
    %c0_32 = arith.constant 0 : index
    %70 = vector.load %arg3[%c544, %c0_32] : memref<944x256xf32, #tpu.memory_space<vmem>>, vector<256x128xf32>
    %c800 = arith.constant 800 : index
    %c0_33 = arith.constant 0 : index
    %71 = vector.load %arg3[%c800, %c0_33] : memref<944x256xf32, #tpu.memory_space<vmem>>, vector<8x128xf32>
    %cst_34 = arith.constant dense<0.000000e+00> : vector<8x128xf32>
    %72 = tpu.matmul %69, %70, %cst_34 {dimension_numbers = #tpu.dot_dimension_numbers<[1], [0], [0], [1], [0, 0, 1, 1], [], []>} : vector<8x256xf32>, vector<256x128xf32>, vector<8x128xf32> -> vector<8x128xf32>
    %cst_35 = arith.constant dense<0.000000e+00> : vector<8x128xf32>
    %73 = tpu.matmul %40, %71, %cst_35 {dimension_numbers = #tpu.dot_dimension_numbers<[1], [0], [0], [1], [0, 0, 1, 1], [], []>} : vector<8x8xf32>, vector<8x128xf32>, vector<8x128xf32> -> vector<8x128xf32>
    %74 = arith.addf %72, %73 : vector<8x128xf32>
    %cst_36 = arith.constant 0.000000e+00 : f32
    %75 = vector.broadcast %cst_36 : f32 to vector<8x128xf32>
    %76 = arith.maximumf %74, %75 : vector<8x128xf32>
    %c808 = arith.constant 808 : index
    %c0_37 = arith.constant 0 : index
    %77 = vector.load %arg3[%c808, %c0_37] : memref<944x256xf32, #tpu.memory_space<vmem>>, vector<128x256xf32>
    %c936 = arith.constant 936 : index
    %c0_38 = arith.constant 0 : index
    %78 = vector.load %arg3[%c936, %c0_38] : memref<944x256xf32, #tpu.memory_space<vmem>>, vector<8x256xf32>
    %cst_39 = arith.constant dense<0.000000e+00> : vector<8x256xf32>
    %79 = tpu.matmul %76, %77, %cst_39 {dimension_numbers = #tpu.dot_dimension_numbers<[1], [0], [0], [1], [0, 0, 1, 1], [], []>} : vector<8x128xf32>, vector<128x256xf32>, vector<8x256xf32> -> vector<8x256xf32>
    %cst_40 = arith.constant dense<0.000000e+00> : vector<8x256xf32>
    %80 = tpu.matmul %40, %78, %cst_40 {dimension_numbers = #tpu.dot_dimension_numbers<[1], [0], [0], [1], [0, 0, 1, 1], [], []>} : vector<8x8xf32>, vector<8x256xf32>, vector<8x256xf32> -> vector<8x256xf32>
    %81 = arith.addf %79, %80 : vector<8x256xf32>
    %c0_41 = arith.constant 0 : index
    %c0_42 = arith.constant 0 : index
    %82 = vector.load %arg4[%c0_41, %c0_42] : memref<8x256xf32, #tpu.memory_space<vmem>>, vector<8x256xf32>
    tpu.vector_store %arg4[%c0_41, %c0_42], %81 {strides = array<i32>} : memref<8x256xf32, #tpu.memory_space<vmem>>, vector<8x256xf32>,
    return
  }
  func.func @transform_0(%arg0: i32) -> (i32, i32) {
    %c0_i32 = arith.constant 0 : i32
    %c0_i32_0 = arith.constant 0 : i32
    return %arg0, %c0_i32 : i32, i32
  }
  func.func @transform_1(%arg0: i32) -> (i32, i32) {
    %c0_i32 = arith.constant 0 : i32
    %c0_i32_0 = arith.constant 0 : i32
    return %arg0, %c0_i32 : i32, i32
  }
  func.func @transform_2(%arg0: i32) -> (i32, i32) {
    %c0_i32 = arith.constant 0 : i32
    %c0_i32_0 = arith.constant 0 : i32
    %c0_i32_1 = arith.constant 0 : i32
    return %c0_i32, %c0_i32_0 : i32, i32
  }
  func.func @transform_3(%arg0: i32) -> (i32, i32) {
    %c0_i32 = arith.constant 0 : i32
    %c0_i32_0 = arith.constant 0 : i32
    return %arg0, %c0_i32 : i32, i32
  }
}

</mosaic_0001>

<bundles_post_ra>
// kernel: forward.1
= control target key start
LH: loop header
LB: loop body
LE: loop exit
PB: predicated region body
PF: predicated region fallthrough
CT: control target
= control target key end

     0   :  { %8 = vsyncpa [#allocation3], 0  ;;  %s1747_s12 = smov [#allocation2]   ;;  %s1889_s0 = inlined_call_operand.vmem [shape: f32[8,1], index: 0, kind: input, shape index: {}]   ;;  %s1890_s1 = inlined_call_operand.vmem [shape: f32[8,128], index: 1, kind: input, shape index: {}]   ;;  %s1891_s2 = inlined_call_operand.hbm [shape: f32[944,256], index: 2, kind: input, shape index: {}]   ;;  %s1892_s3 = inlined_call_operand.vmem [shape: f32[8,256], index: 3, kind: output, shape index: {}]  }
   0x1   :  { %s18_s13 = sshll.u32 %s1747_s12, 4  ;;  %s1723_s16 = scalar_lea.hbm %s1891_s2, 30208  ;;  %s19_s13 = int_to_ptr.vmem [resolvable:$true] %s18_s13 }
   0x2   :  { %p1724_p0 = scmp.ne.s32.totalorder %s1891_s2, %s1723_s16  ;;  %p1727_p1 = scmp.lt.u32.totalorder %s1723_s16, %s1891_s2 }
   0x4   :  { %p1729_p2 = pnand %p1727_p1, %p1724_p0 }
   0x6   :  { %1732 = shalt.err (!%p1729_p2)
}
   0x7   :  { %s1733_s21 = scalar_lea.vmem %s19_s13, 30208  ;;  %p1738_p4 = scmp.lt.s32.totalorder %s19_s13, %s19_s13 }
   0x8   :  { %p1734_p3 = scmp.ne.s32.totalorder %s19_s13, %s1733_s21  ;;  %p1739_p5 = scmp.lt.s32.totalorder %s1733_s21, %s1733_s21 }
   0xa   :  { %p1740_p6 = por %p1739_p5, %p1738_p4 }
   0xc   :  { %p1741_p7 = pnand %p1740_p6, %p1734_p3 }
   0xe   :  { %1744 = shalt.err (!%p1741_p7)
}
   0xf   :  { %s1748_s22 = smov 256   ;;  %s1749_s23 = smov 16  }
  0x10   :  { %24 = dma.hbm_to_vmem [thread:$0]  %s1891_s2, 30208, %s19_s13, [#allocation3], %s1748_s22, %s1748_s22, %s1749_s23  }
  0x11   :  { %1745 = dma.done.wait [#allocation3], 30208  }
  0x12   :  { %1746 = vsyncadd [#allocation3], 4294937088  ;;  %v1750_v0 = vmov 0   ;;  %v1751_v1 = vmov 0.0   ;;  %v28_v2 = vld [vmem:[%s1889_s0] sm:$0xff] }
  0x13   :  { %1710 = vset.pattern.permute.xlu0 %v1750_v0  ;;  %1391 = vmatprep.subr.mxu0 %v1751_v1  ;;  %v1797_v3 = vmul.f32 1.5707964, %v28_v2  ;;  %v1752_v15 = vmov 683565275   ;;  %v1753_v17 = vmov 2475754826  }
  0x14   :  { %1431 = vmatprep.subr.mxu1 %v1751_v1  ;;  %v1754_v19 = vmov 2131351028   ;;  %v1755_v21 = vmov 2102212464   ;;  %v1756_v23 = vmov 920167782  }
  0x15   :  { %v33_v4 = vand.u32 2139095040, %v1797_v3  ;;  %v30_v6 = vand.u32 2147483647, %v1797_v3  ;;  %v1757_v30 = vmov 1326507024   ;;  %vm32_vm7 = vcmp.lt.s32.totalorder %v1797_v3, 0 }
  0x16   :  { %vm122_vm15 = vweird.f32 %v1797_v3 }
  0x17   :  { %v34_v5 = vshrl.u32 %v33_v4, 23  ;;  %v37_v9 = vand.u32 8388607, %v30_v6  ;;  %vm31_vm8 = vcmp.le.f32.partialorder %v30_v6, 0.7853982 }
  0x19   :  { %v1283_v7 = vadd.s32 4294967169, %v34_v5  ;;  %v38_v12 = vor.u32 8388608, %v37_v9 }
  0x1b   :  { %v40_v8 = vadd.s32 1, %v1283_v7  ;;  %v78_v32 = vshll.u32 %v38_v12, 8 }
  0x1d   :  { %vm41_vm0 = vcmp.gt.s32.totalorder %v40_v8, 0 }
  0x1e   :  { %v42_v10 = vsel %vm41_vm0, %v40_v8, 0  ;;  %vm1758_vm0 = vmmov 0  }
  0x1f   :  { %v44_v11 = vand.u32 31, %v42_v10  ;;  %v43_v13 = vshrl.u32 %v42_v10, 5  ;;  %1393 = vmatprep.mubr.msk.f32.mxu0 %vm1758_vm0, %v1751_v1  ;;  %1433 = vmatprep.mubr.msk.f32.mxu1 %vm1758_vm0, %v1751_v1 }
  0x21   :  { %v45_v14 = vsub.s32 32, %v44_v11  ;;  %v47_v16 = vshll.u32 %v1752_v15, %v44_v11  ;;  %v50_v18 = vshll.u32 %v1753_v17, %v44_v11  ;;  %v53_v20 = vshll.u32 %v1754_v19, %v44_v11 }
  0x22   :  { %v56_v22 = vshll.u32 %v1755_v21, %v44_v11  ;;  %v59_v24 = vshll.u32 %v1756_v23, %v44_v11  ;;  %vm62_vm1 = vcmp.lt.s32.totalorder %v43_v13, 1  ;;  %vm65_vm2 = vcmp.lt.s32.totalorder %v43_v13, 4 }
  0x23   :  { %v46_v25 = vshrl.u32 %v1752_v15, %v45_v14  ;;  %v48_v26 = vshrl.u32 %v1753_v17, %v45_v14  ;;  %v51_v27 = vshrl.u32 %v1754_v19, %v45_v14  ;;  %v54_v28 = vshrl.u32 %v1755_v21, %v45_v14 }
  0x24   :  { %v57_v29 = vshrl.u32 %v1756_v23, %v45_v14  ;;  %v60_v31 = vshrl.u32 %v1757_v30, %v45_v14  ;;  %vm63_vm3 = vcmp.lt.s32.totalorder %v43_v13, 2  ;;  %vm64_vm4 = vcmp.lt.s32.totalorder %v43_v13, 3 }
  0x25   :  { %v49_v33 = vor.u32 %v48_v26, %v47_v16  ;;  %v52_v34 = vor.u32 %v51_v27, %v50_v18  ;;  %v55_v35 = vor.u32 %v54_v28, %v53_v20 }
  0x26   :  { %v58_v36 = vor.u32 %v57_v29, %v56_v22  ;;  %v61_v37 = vor.u32 %v60_v31, %v59_v24 }
  0x27   :  { %v66_v38 = vsel %vm62_vm1, %v46_v25, %v49_v33  ;;  %v67_v39 = vsel %vm65_vm2, %v55_v35, 2102212464  ;;  %v70_v40 = vsel %vm62_vm1, %v49_v33, %v52_v34  ;;  %v74_v41 = vsel %vm62_vm1, %v52_v34, %v55_v35 }
  0x28   :  { %v68_v42 = vsel %vm64_vm4, %v52_v34, %v67_v39  ;;  %v71_v43 = vsel %vm65_vm2, %v58_v36, 920167782  ;;  %v75_v44 = vsel %vm65_vm2, %v61_v37, 1326507024 }
  0x29   :  { %v72_v45 = vsel %vm64_vm4, %v55_v35, %v71_v43  ;;  %v76_v46 = vsel %vm64_vm4, %v58_v36, %v75_v44  ;;  %v69_v47 = vsel %vm63_vm3, %v66_v38, %v68_v42  ;;  %vm287_vm4 = vcmask 64512  }
  0x2a   :  { %v73_v48 = vsel %vm63_vm3, %v70_v40, %v72_v45  ;;  %v77_v49 = vsel %vm63_vm3, %v74_v41, %v76_v46  ;;  %v85_v54 = vmul.u32 %v78_v32, %v69_v47 }
  0x2b   :  { %v1803_v50 = vmul.u32.u64.low %v78_v32, %v77_v49  ;;  %v1804_v51 = vmul.u32.u64.high %v78_v32, %v77_v49, %v1803_v50  ;;  %v1806_v52 = vmul.u32.u64.low %v78_v32, %v73_v48  ;;  %v1807_v53 = vmul.u32.u64.high %v78_v32, %v73_v48, %v1806_v52  ;;  %v286_v49 = vld [vmem:[#allocation2 + $0x100] sm:$0xff] }
  0x2c   :  { %1392 = vmatpush3.msra.mxu0 %v286_v49  ;;  %v448_v50 = vld [vmem:[#allocation2 + $0x210] sm:$0xff] }
  0x2d   :  { %vm87_vm5 = vc.u32 %v1804_v51, %v1806_v52  ;;  %v88_v55 = vadd.s32 1, %v1807_v53  ;;  %v86_v4 = vadd.s32 %v1806_v52, %v1804_v51  ;;  %v1759_v51 = vmov 0.0|0.0   ;;  %1432 = vmatpush3.msra.mxu1 %v448_v50  ;;  %v593_v49 = vld [vmem:[#allocation2 + $0x250] sm:$0xff] }
  0x2e   :  { %1516 = vmatprep.subr.bf16.mxu0 %v1759_v51  ;;  %1540 = vmatprep.subr.bf16.mxu1 %v1759_v51  ;;  %v251_v52 = vlaneseq }
  0x2f   :  { %v89_v56 = vsel %vm87_vm5, %v88_v55, %v1807_v53  ;;  %v270_v55 = vld [vmem:[#allocation2] sm:$0xff] }
  0x30   :  { %v90_v57 = vadd.s32 %v89_v56, %v85_v54  ;;  %v252_v53 = vand.u32 127, %v251_v52  ;;  %v271_v56 = vld [vmem:[#allocation2 + $0x10] sm:$0xff]  ;;  %v594_v52 = vld [vmem:[#allocation2 + $0x260] sm:$0xff] }
  0x32   :  { %v91_v58 = vadd.s32 536870912, %v90_v57  ;;  %vm255_vm1 = vcmp.eq.s32.totalorder %v252_v53, 2  ;;  %vm254_vm2 = vcmp.eq.s32.totalorder %v252_v53, 1  ;;  %vm253_vm3 = vcmp.eq.s32.totalorder %v252_v53, 0  ;;  %v595_v53 = vld [vmem:[#allocation2 + $0x270] sm:$0xff] }
  0x34   :  { %v92_v59 = vshrl.u32 %v91_v58, 30  ;;  %v432_v58 = vld [vmem:[#allocation2 + $0x110] sm:$0xff] }
  0x36   :  { %v93_v60 = vshll.u32 %v92_v59, 30  ;;  %v116_v18 = vsub.s32 4, %v92_v59 }
  0x38   :  { %v94_v61 = vsub.s32 %v90_v57, %v93_v60  ;;  %v117_v21 = vsel %vm32_vm7, %v116_v18, %v92_v59  ;;  %v256_v57 = vsel %vm255_vm1, 1.0, %v1751_v1  ;;  %v433_v59 = vld [vmem:[#allocation2 + $0x120] sm:$0xff]  ;;  %v1517_v60 = vpack.c.bf16 %v271_v56, %v270_v55  ;;  %v438_v18 = vld [vmem:[#allocation2 + $0x170] sm:$0xff] }
  0x39   :  { %v119_v23 = vsel %vm31_vm8, 0, %v117_v21  ;;  %v278_v21 = vld [vmem:[#allocation2 + $0x80] sm:$0xff]  ;;  %v597_v56 = vld [vmem:[#allocation2 + $0x290] sm:$0xff] }
  0x3a   :  { %v96_v62 = vsub.s32 0, %v94_v61  ;;  %v123_v24 = vadd.s32 3, %v119_v23  ;;  %v227_v26 = vand.u32 3, %v119_v23  ;;  %v596_v55 = vld [vmem:[#allocation2 + $0x280] sm:$0xff] }
  0x3c   :  { %v1284_v63 = vmin.u32 %v96_v62, %v94_v61  ;;  %v124_v25 = vand.u32 3, %v123_v24  ;;  %vm232_vm10 = vcmp.eq.s32.totalorder %v227_v26, 2  ;;  %vm229_vm12 = vcmp.eq.s32.totalorder %v227_v26, 0  ;;  %v440_v24 = vld [vmem:[#allocation2 + $0x190] sm:$0xff] }
  0x3d   :  { %vm228_vm14 = vcmp.lt.s32.totalorder %v227_v26, 2 }
  0x3e   :  { %v98_v0 = vclz %v1284_v63  ;;  %vm129_vm9 = vcmp.eq.s32.totalorder %v124_v25, 2  ;;  %vm126_vm11 = vcmp.eq.s32.totalorder %v124_v25, 0  ;;  %vm125_vm13 = vcmp.lt.s32.totalorder %v124_v25, 2  ;;  %v272_v63 = vld [vmem:[#allocation2 + $0x20] sm:$0xff] }
  0x3f   :  { %v441_v25 = vld [vmem:[#allocation2 + $0x1a0] sm:$0xff] }
  0x40   :  { %v1285_v2 = vadd.s32 4294967294, %v98_v0  ;;  %v273_v0 = vld [vmem:[#allocation2 + $0x30] sm:$0xff] }
  0x42   :  { %vm1286_vm6 = vcmp.lt.s32.totalorder %v1285_v2, 0 }
  0x43   :  { %v101_v5 = vsel %vm1286_vm6, 0, %v1285_v2  ;;  %v1541_v2 = vpack.c.bf16 %v433_v59, %v432_v58  ;;  %v598_v58 = vld [vmem:[#allocation2 + $0x2a0] sm:$0xff]  ;;  %v599_v59 = vld [vmem:[#allocation2 + $0x2b0] sm:$0xff] }
  0x44   :  { %v102_v7 = vsub.s32 32, %v101_v5  ;;  %v103_v8 = vshll.u32 %v94_v61, %v101_v5  ;;  %v106_v9 = vsub.s32 4294967266, %v101_v5  ;;  %v434_v5 = vld [vmem:[#allocation2 + $0x130] sm:$0xff] }
  0x46   :  { %v104_v10 = vshrl.u32 %v86_v4, %v102_v7  ;;  %v107_v11 = vadd.s32 127, %v106_v9  ;;  %v435_v7 = vld [vmem:[#allocation2 + $0x140] sm:$0xff] }
  0x47   :  { %v274_v9 = vld [vmem:[#allocation2 + $0x40] sm:$0xff] }
  0x48   :  { %v105_v12 = vor.u32 %v104_v10, %v103_v8  ;;  %v108_v13 = vshll.u32 %v107_v11, 23  ;;  %v1520_v8 = vpack.c.bf16 %v273_v0, %v272_v63  ;;  %v275_v10 = vld [vmem:[#allocation2 + $0x50] sm:$0xff]  ;;  %v1544_v11 = vpack.c.bf16 %v435_v7, %v434_v5  ;;  %v602_v0 = vld [vmem:[#allocation2 + $0x2e0] sm:$0xff] }
  0x4a   :  { %v109_v14 = vor.u32 4788187, %v108_v13  ;;  %v112_v15 = vcvt.s32.f32 %v105_v12  ;;  %v436_v12 = vld [vmem:[#allocation2 + $0x150] sm:$0xff]  ;;  %v437_v13 = vld [vmem:[#allocation2 + $0x160] sm:$0xff] }
  0x4c   :  { %v110_v16 = vand.u32 2147483647, %v109_v14  ;;  %v1523_v14 = vpack.c.bf16 %v275_v10, %v274_v9  ;;  %v606_v10 = vld [vmem:[#allocation2 + $0x320] sm:$0xff] }
  0x4e   :  { %v113_v17 = vmul.f32 %v112_v15, %v110_v16  ;;  %v276_v15 = vld [vmem:[#allocation2 + $0x60] sm:$0xff]  ;;  %v277_v16 = vld [vmem:[#allocation2 + $0x70] sm:$0xff] }
  0x50   :  { %v114_v19 = vxor.u32 2147483648, %v113_v17 }
  0x52   :  { %v115_v20 = vsel %vm32_vm7, %v114_v19, %v113_v17  ;;  %v1547_v17 = vpack.c.bf16 %v437_v13, %v436_v12  ;;  %v439_v19 = vld [vmem:[#allocation2 + $0x180] sm:$0xff]  ;;  %v780_v12 = vld [vmem:[#allocation2 + $0x430] sm:$0xff] }
  0x53   :  { %v118_v22 = vsel %vm31_vm8, %v1797_v3, %v115_v20  ;;  %v1526_v20 = vpack.c.bf16 %v277_v16, %v276_v15  ;;  %v1550_v23 = vpack.c.bf16 %v439_v19, %v438_v18  ;;  %v605_v13 = vld [vmem:[#allocation2 + $0x310] sm:$0xff]  ;;  %v749_v15 = vld [vmem:[#allocation2 + $0x338] sm:$0xff]  ;;  %v751_v16 = vld [vmem:[#allocation2 + $0x348] sm:$0xff] }
  0x54   :  { %1711 = vcosq.f32 %v118_v22  ;;  %v1588_v18 = vpack.c.bf16 %v751_v16, %v749_v15  ;;  %v750_v19 = vld [vmem:[#allocation2 + $0x340] sm:$0xff]  ;;  %v945_v16 = vld [vmem:[#allocation2 + $0x570] sm:$0xff] }
  0x55   :  { %1713 = vsinq.f32 %v118_v22  ;;  %v279_v22 = vld [vmem:[#allocation2 + $0x90] sm:$0xff]  ;;  %v944_v15 = vld [vmem:[#allocation2 + $0x560] sm:$0xff] }
  0x56   :  { %v1529_v26 = vpack.c.bf16 %v279_v22, %v278_v21  ;;  %v755_v21 = vld [vmem:[#allocation2 + $0x368] sm:$0xff] }
  0x5e   :  { %v1712_v27 = vpop.eup %1711 }
  0x5f   :  { %v1714_v28 = vpop.eup %1713  ;;  %v130_v29 = vxor.u32 2147483648, %v1712_v27 }
  0x60   :  { %v127_v6 = vxor.u32 2147483648, %v1714_v28 }
  0x61   :  { %v234_v30 = vsel %vm232_vm10, %v130_v29, %v1714_v28  ;;  %v131_v31 = vsel %vm129_vm9, %v130_v29, %v1714_v28  ;;  %v281_v28 = vld [vmem:[#allocation2 + $0xb0] sm:$0xff]  ;;  %v1553_v29 = vpack.c.bf16 %v441_v25, %v440_v24  ;;  %v754_v25 = vld [vmem:[#allocation2 + $0x360] sm:$0xff] }
  0x62   :  { %v231_v32 = vsel %vm229_vm12, %v1712_v27, %v127_v6  ;;  %v128_v33 = vsel %vm126_vm11, %v1712_v27, %v127_v6  ;;  %v280_v27 = vld [vmem:[#allocation2 + $0xa0] sm:$0xff]  ;;  %v442_v6 = vld [vmem:[#allocation2 + $0x1b0] sm:$0xff] }
  0x63   :  { %v235_v34 = vsel %vm228_vm14, %v231_v32, %v234_v30  ;;  %v132_v35 = vsel %vm125_vm13, %v128_v33, %v131_v31  ;;  %v443_v30 = vld [vmem:[#allocation2 + $0x1c0] sm:$0xff]  ;;  %v1532_v31 = vpack.c.bf16 %v281_v28, %v280_v27  ;;  %v283_v33 = vld [vmem:[#allocation2 + $0xd0] sm:$0xff]  ;;  %v759_v27 = vld [vmem:[#allocation2 + $0x388] sm:$0xff] }
  0x64   :  { %v236_v36 = vsel %vm122_vm15, nan, %v235_v34  ;;  %v133_v37 = vsel %vm122_vm15, nan, %v132_v35  ;;  %v282_v32 = vld [vmem:[#allocation2 + $0xc0] sm:$0xff]  ;;  %v1556_v34 = vpack.c.bf16 %v443_v30, %v442_v6  ;;  %v444_v35 = vld [vmem:[#allocation2 + $0x1d0] sm:$0xff] }
  0x65   :  { %v244_v38 = vsub.f32 0.0, %v236_v36  ;;  %v237_v39 = vsub.f32 0.0, %v133_v37  ;;  %v752_v24 = vld [vmem:[#allocation2 + $0x350] sm:$0xff]  ;;  %v758_v30 = vld [vmem:[#allocation2 + $0x380] sm:$0xff] }
  0x66   :  { %v1594_v28 = vpack.c.bf16 %v754_v25, %v752_v24  ;;  %v756_v6 = vld [vmem:[#allocation2 + $0x370] sm:$0xff] }
  0x67   :  { %v245_v40 = vmul.f32 1.442695, %v244_v38  ;;  %v238_v41 = vmul.f32 1.442695, %v237_v39  ;;  %v284_v38 = vld [vmem:[#allocation2 + $0xe0] sm:$0xff]  ;;  %v285_v39 = vld [vmem:[#allocation2 + $0xf0] sm:$0xff] }
  0x68   :  { %v947_v24 = vld [vmem:[#allocation2 + $0x590] sm:$0xff] }
  0x69   :  { %1715 = vpow2.f32 %v245_v40 }
  0x6a   :  { %1717 = vpow2.f32 %v238_v41  ;;  %v1538_v41 = vpack.c.bf16 %v285_v39, %v284_v38  ;;  %v767_v38 = vld [vmem:[#allocation2 + $0x3c8] sm:$0xff] }
  0x73   :  { %v1716_v42 = vpop.eup %1715 }
  0x74   :  { %v1718_v43 = vpop.eup %1717  ;;  %v247_v44 = vadd.f32 1.0, %v1716_v42  ;;  %v269_v42 = vld [vmem:[%s1890_s1] sm:$0xff] }
  0x75   :  { %v240_v45 = vadd.f32 1.0, %v1718_v43  ;;  %v446_v43 = vld [vmem:[#allocation2 + $0x1f0] sm:$0xff] }
  0x76   :  { %1719 = vrcp.f32 %v247_v44  ;;  %v447_v44 = vld [vmem:[#allocation2 + $0x200] sm:$0xff] }
  0x77   :  { %1721 = vrcp.f32 %v240_v45  ;;  %v1562_v45 = vpack.c.bf16 %v447_v44, %v446_v43  ;;  %v769_v43 = vld [vmem:[#allocation2 + $0x3d8] sm:$0xff]  ;;  %v771_v44 = vld [vmem:[#allocation2 + $0x3e8] sm:$0xff] }
  0x80   :  { %v1720_v3 = vpop.eup %1719 }
  0x81   :  { %v1722_v46 = vpop.eup %1721  ;;  %v250_v47 = vmul.f32 %v1720_v3, %v236_v36  ;;  %v445_v36 = vld [vmem:[#allocation2 + $0x1e0] sm:$0xff] }
  0x82   :  { %v243_v48 = vmul.f32 %v1722_v46, %v133_v37  ;;  %v1535_v37 = vpack.c.bf16 %v283_v33, %v282_v32  ;;  %v1559_v40 = vpack.c.bf16 %v445_v36, %v444_v35  ;;  %v590_v3 = vld [vmem:[#allocation2 + $0x220] sm:$0xff]  ;;  %v591_v46 = vld [vmem:[#allocation2 + $0x230] sm:$0xff]  ;;  %v763_v32 = vld [vmem:[#allocation2 + $0x3a8] sm:$0xff]  ;;  %v1598_v33 = vpack.c.bf16 %v758_v30, %v756_v6 }
  0x83   :  { %259 = vperm.xlu0 %1710, %v250_v47   ;;  %v592_v47 = vld [vmem:[#allocation2 + $0x240] sm:$0xff]  ;;  %v760_v35 = vld [vmem:[#allocation2 + $0x390] sm:$0xff] }
  0x84   :  { %v1568_v50 = vpack.c.bf16 %v593_v49, %v592_v47  ;;  %v762_v36 = vld [vmem:[#allocation2 + $0x3a0] sm:$0xff]  ;;  %v775_v49 = vld [vmem:[#allocation2 + $0x408] sm:$0xff]  ;;  %v949_v30 = vld [vmem:[#allocation2 + $0x5b0] sm:$0xff] }
  0x85   :  { %v1602_v39 = vpack.c.bf16 %v762_v36, %v760_v35  ;;  %v770_v47 = vld [vmem:[#allocation2 + $0x3e0] sm:$0xff]  ;;  %v951_v36 = vld [vmem:[#allocation2 + $0x5d0] sm:$0xff] }
  0x86   :  { %v948_v6 = vld [vmem:[#allocation2 + $0x5a0] sm:$0xff] }
  0x87   :  { %265 = vperm.xlu0 %1710, %v243_v48   ;;  %v1565_v48 = vpack.c.bf16 %v591_v46, %v590_v3  ;;  %v1608_v3 = vpack.c.bf16 %v771_v44, %v769_v43  ;;  %v768_v46 = vld [vmem:[#allocation2 + $0x3d0] sm:$0xff]  ;;  %v950_v35 = vld [vmem:[#allocation2 + $0x5c0] sm:$0xff] }
 0x102   :  { %v260_v54 = vpop.permute.xlu0 %259 }
 0x103   :  { %v262_v61 = vsel %vm254_vm2, %v260_v54, %v256_v57  ;;  %v1571_v54 = vpack.c.bf16 %v595_v53, %v594_v52  ;;  %v1574_v57 = vpack.c.bf16 %v597_v56, %v596_v55  ;;  %v772_v53 = vld [vmem:[#allocation2 + $0x3f0] sm:$0xff] }
 0x106   :  { %v266_v62 = vpop.permute.xlu0 %265 }
 0x107   :  { %v1825_v4 = vsel %vm253_vm3, %v266_v62, %v262_v61  ;;  %v600_v61 = vld [vmem:[#allocation2 + $0x2c0] sm:$0xff]  ;;  %v601_v62 = vld [vmem:[#allocation2 + $0x2d0] sm:$0xff] }
 0x108   :  { %1394 = vmatmul.mubr.msk.f32.vlgmr.msra.gmra.mrb[0].mxu0 %vm287_vm4, %v1825_v4  ;;  %1434 = vmatmul.mubr.msk.f32.vlgmr.msra.gmra.mrb[0].mxu1 %vm287_vm4, %v1825_v4  ;;  %v1580_v63 = vpack.c.bf16 %v601_v62, %v600_v61 }
 0x109   :  { %1518 = vmatpush3.bf16.msra.mxu0 %v1517_v60  ;;  %1428 = vmatprep.mubr.msk.f32.mxu0 %vm1758_vm0, %v1751_v1  ;;  %v1577_v60 = vpack.c.bf16 %v599_v59, %v598_v58  ;;  %v958_v59 = vld [vmem:[#allocation2 + $0x640] sm:$0xff] }
 0x10a   :  { %1519 = vmatprep.subr.bf16.mxu0 %v1759_v51  ;;  %1542 = vmatpush3.bf16.msra.mxu1 %v1541_v2  ;;  %v603_v2 = vld [vmem:[#allocation2 + $0x2f0] sm:$0xff] }
 0x10b   :  { %1543 = vmatprep.subr.bf16.mxu1 %v1759_v51  ;;  %1468 = vmatprep.mubr.msk.f32.mxu1 %vm1758_vm0, %v1751_v1  ;;  %v1583_v5 = vpack.c.bf16 %v603_v2, %v602_v0  ;;  %v777_v0 = vld [vmem:[#allocation2 + $0x418] sm:$0xff]  ;;  %v779_v2 = vld [vmem:[#allocation2 + $0x428] sm:$0xff] }
 0x10d   :  { %1521 = vmatpush3.bf16.msra.mxu0 %v1520_v8 }
 0x10e   :  { %1522 = vmatprep.subr.bf16.mxu0 %v1759_v51  ;;  %1545 = vmatpush3.bf16.msra.mxu1 %v1544_v11  ;;  %v781_v11 = vld [vmem:[#allocation2 + $0x438] sm:$0xff] }
 0x10f   :  { %1546 = vmatprep.subr.bf16.mxu1 %v1759_v51 }
 0x111   :  { %1524 = vmatpush3.bf16.msra.mxu0 %v1523_v14 }
 0x112   :  { %1525 = vmatprep.subr.bf16.mxu0 %v1759_v51  ;;  %1548 = vmatpush3.bf16.msra.mxu1 %v1547_v17  ;;  %v748_v17 = vld [vmem:[#allocation2 + $0x330] sm:$0xff] }
 0x113   :  { %1549 = vmatprep.subr.bf16.mxu1 %v1759_v51  ;;  %v1590_v22 = vpack.c.bf16 %v750_v19, %v748_v17  ;;  %v1624_v19 = vpack.c.bf16 %v945_v16, %v944_v15  ;;  %v1110_v15 = vld [vmem:[#allocation2 + $0x6a0] sm:$0xff]  ;;  %v1113_v16 = vld [vmem:[#allocation2 + $0x6b8] sm:$0xff] }
 0x115   :  { %1527 = vmatpush3.bf16.msra.mxu0 %v1526_v20  ;;  %v753_v20 = vld [vmem:[#allocation2 + $0x358] sm:$0xff] }
 0x116   :  { %1528 = vmatprep.subr.bf16.mxu0 %v1759_v51  ;;  %1551 = vmatpush3.bf16.msra.mxu1 %v1550_v23  ;;  %v1592_v23 = vpack.c.bf16 %v755_v21, %v753_v20  ;;  %v928_v20 = vld [vmem:[#allocation2 + $0x460] sm:$0xff]  ;;  %v929_v21 = vld [vmem:[#allocation2 + $0x470] sm:$0xff] }
 0x117   :  { %1552 = vmatprep.subr.bf16.mxu1 %v1759_v51 }
 0x119   :  { %1530 = vmatpush3.bf16.msra.mxu0 %v1529_v26  ;;  %v757_v26 = vld [vmem:[#allocation2 + $0x378] sm:$0xff] }
 0x11a   :  { %1531 = vmatprep.subr.bf16.mxu0 %v1759_v51  ;;  %1554 = vmatpush3.bf16.msra.mxu1 %v1553_v29  ;;  %v1596_v29 = vpack.c.bf16 %v759_v27, %v757_v26  ;;  %v1626_v26 = vpack.c.bf16 %v929_v21, %v928_v20  ;;  %v1117_v20 = vld [vmem:[#allocation2 + $0x6d8] sm:$0xff]  ;;  %v1119_v21 = vld [vmem:[#allocation2 + $0x6e8] sm:$0xff] }
 0x11b   :  { %1555 = vmatprep.subr.bf16.mxu1 %v1759_v51 }
 0x11d   :  { %1533 = vmatpush3.bf16.msra.mxu0 %v1532_v31  ;;  %v761_v31 = vld [vmem:[#allocation2 + $0x398] sm:$0xff] }
 0x11e   :  { %1534 = vmatprep.subr.bf16.mxu0 %v1759_v51  ;;  %1557 = vmatpush3.bf16.msra.mxu1 %v1556_v34  ;;  %v1600_v34 = vpack.c.bf16 %v763_v32, %v761_v31  ;;  %v1632_v32 = vpack.c.bf16 %v949_v30, %v948_v6  ;;  %v1120_v30 = vld [vmem:[#allocation2 + $0x6f0] sm:$0xff] }
 0x11f   :  { %1558 = vmatprep.subr.bf16.mxu1 %v1759_v51 }
 0x121   :  { %1536 = vmatpush3.bf16.msra.mxu0 %v1535_v37  ;;  %v765_v37 = vld [vmem:[#allocation2 + $0x3b8] sm:$0xff] }
 0x122   :  { %1537 = vmatprep.subr.bf16.mxu0 %v1759_v51  ;;  %1560 = vmatpush3.bf16.msra.mxu1 %v1559_v40  ;;  %v1604_v40 = vpack.c.bf16 %v767_v38, %v765_v37  ;;  %v1636_v38 = vpack.c.bf16 %v951_v36, %v950_v35 }
 0x123   :  { %1561 = vmatprep.subr.bf16.mxu1 %v1759_v51 }
 0x125   :  { %1539 = vmatpush3.bf16.msra.mxu0 %v1538_v41  ;;  %v764_v41 = vld [vmem:[#allocation2 + $0x3b0] sm:$0xff] }
 0x126   :  { %1564 = vmatprep.subr.bf16.mxu0 %v1759_v51  ;;  %1563 = vmatpush3.bf16.msra.mxu1 %v1562_v45 }
 0x127   :  { %1471 = vmatprep.subr.mxu1 %v1751_v1 }
 0x128   :  { %1429 = vmatmul.mubr.f32.vlgmr.msra.gmra.mrb[0].mxu0 %v269_v42  ;;  %v766_v42 = vld [vmem:[#allocation2 + $0x3c0] sm:$0xff] }
 0x129   :  { %1508 = vmatprep.mubr.msk.f32.mxu0 %vm1758_vm0, %v1751_v1  ;;  %1566 = vmatpush3.bf16.msra.mxu0 %v1565_v48  ;;  %v1606_v45 = vpack.c.bf16 %v766_v42, %v764_v41  ;;  %v773_v48 = vld [vmem:[#allocation2 + $0x3f8] sm:$0xff]  ;;  %v952_v41 = vld [vmem:[#allocation2 + $0x5e0] sm:$0xff]  ;;  %v953_v42 = vld [vmem:[#allocation2 + $0x5f0] sm:$0xff] }
 0x12a   :  { %1567 = vmatprep.subr.bf16.mxu0 %v1759_v51  ;;  %v1612_v52 = vpack.c.bf16 %v775_v49, %v773_v48  ;;  %v1640_v44 = vpack.c.bf16 %v953_v42, %v952_v41  ;;  %v1126_v41 = vld [vmem:[#allocation2 + $0x720] sm:$0xff] }
 0x12d   :  { %1569 = vmatpush3.bf16.msra.mxu0 %v1568_v50  ;;  %v1610_v50 = vpack.c.bf16 %v770_v47, %v768_v46  ;;  %v954_v46 = vld [vmem:[#allocation2 + $0x600] sm:$0xff]  ;;  %v955_v47 = vld [vmem:[#allocation2 + $0x610] sm:$0xff] }
 0x12e   :  { %1570 = vmatprep.subr.bf16.mxu0 %v1759_v51  ;;  %v1644_v49 = vpack.c.bf16 %v955_v47, %v954_v46  ;;  %v1130_v46 = vld [vmem:[#allocation2 + $0x740] sm:$0xff] }
 0x131   :  { %1572 = vmatpush3.bf16.msra.mxu0 %v1571_v54  ;;  %v774_v54 = vld [vmem:[#allocation2 + $0x400] sm:$0xff] }
 0x132   :  { %1573 = vmatprep.subr.bf16.mxu0 %v1759_v51  ;;  %v1614_v55 = vpack.c.bf16 %v774_v54, %v772_v53  ;;  %v956_v54 = vld [vmem:[#allocation2 + $0x620] sm:$0xff] }
 0x135   :  { %1575 = vmatpush3.bf16.msra.mxu0 %v1574_v57 }
 0x136   :  { %1576 = vmatprep.subr.bf16.mxu0 %v1759_v51 }
 0x139   :  { %1578 = vmatpush3.bf16.msra.mxu0 %v1577_v60  ;;  %v1133_v60 = vld [vmem:[#allocation2 + $0x758] sm:$0xff] }
 0x13a   :  { %1579 = vmatprep.subr.bf16.mxu0 %v1759_v51 }
 0x13d   :  { %1581 = vmatpush3.bf16.msra.mxu0 %v1580_v63  ;;  %v1132_v63 = vld [vmem:[#allocation2 + $0x750] sm:$0xff] }
 0x13e   :  { %1582 = vmatprep.subr.bf16.mxu0 %v1759_v51 }
 0x141   :  { %1584 = vmatpush3.bf16.msra.mxu0 %v1583_v5  ;;  %v1616_v5 = vpack.c.bf16 %v779_v2, %v777_v0  ;;  %v1102_v0 = vld [vmem:[#allocation2 + $0x660] sm:$0xff]  ;;  %v1105_v2 = vld [vmem:[#allocation2 + $0x678] sm:$0xff] }
 0x142   :  { %1585 = vmatprep.subr.bf16.mxu0 %v1759_v51  ;;  %v604_v51 = vld [vmem:[#allocation2 + $0x300] sm:$0xff] }
 0x143   :  { %v1586_v14 = vpack.c.bf16 %v605_v13, %v604_v51  ;;  %v926_v51 = vld [vmem:[#allocation2 + $0x440] sm:$0xff]  ;;  %v927_v13 = vld [vmem:[#allocation2 + $0x450] sm:$0xff] }
 0x145   :  { %1587 = vmatpush3.bf16.msra.mxu0 %v1586_v14 }
 0x146   :  { %1511 = vmatprep.subr.mxu0 %v1751_v1 }
 0x1fb   :  { %v427_v7 = vpop.f32.mrb[0].mxu0 }
 0x1fc   :  { %v431_v8 = vmax.f32 %v427_v7, 0.0  ;;  %v1430_v9 = vpop.f32.mrb[1].mxu0  ;;  %v776_v7 = vld [vmem:[#allocation2 + $0x410] sm:$0xff] }
 0x1fe   :  { %1469 = vmatmul.mubr.f32.vlgmr.msra.gmra.mrb[0].mxu1 %v431_v8  ;;  %v778_v8 = vld [vmem:[#allocation2 + $0x420] sm:$0xff] }
 0x1ff   :  { %1472 = vmatpush3.msra.mxu1 %v606_v10  ;;  %1473 = vmatprep.mubr.msk.f32.mxu1 %vm1758_vm0, %v1751_v1  ;;  %v1618_v9 = vpack.c.bf16 %v778_v8, %v776_v7  ;;  %v942_v10 = vld [vmem:[#allocation2 + $0x540] sm:$0xff] }
 0x200   :  { %782 = vmatprep.subr.mxu1 %v781_v11  ;;  %v943_v11 = vld [vmem:[#allocation2 + $0x550] sm:$0xff] }
 0x202   :  { %1474 = vmatmul.mubr.msk.f32.vlgmr.msra.gmra.mrb[2].mxu1 %vm287_vm4, %v1825_v4 }
 0x203   :  { %783 = vmatpush1.msra.mxu1 %v780_v12  ;;  %846 = vmatprep.mubr.f32.mxu1 %v1751_v1  ;;  %v1620_v12 = vpack.c.bf16 %v943_v11, %v942_v10  ;;  %v1106_v10 = vld [vmem:[#allocation2 + $0x680] sm:$0xff]  ;;  %v1109_v11 = vld [vmem:[#allocation2 + $0x698] sm:$0xff] }
 0x204   :  { %1589 = vmatprep.subr.bf16.mxu1 %v1588_v18 }
 0x206   :  { %1294 = vmatmul.mubr.msk.f32.vlgmr.msra.gmra.mrb[4].mxu1 %vm287_vm4, %v1825_v4 }
 0x207   :  { %917 = vmatprep.mubr.f32.mxu1 %v1751_v1  ;;  %1591 = vmatpush1.bf16.msra.mxu1 %v1590_v22 }
 0x208   :  { %1593 = vmatprep.subr.bf16.mxu1 %v1592_v23  ;;  %v946_v23 = vld [vmem:[#allocation2 + $0x580] sm:$0xff] }
 0x209   :  { %v1628_v27 = vpack.c.bf16 %v947_v24, %v946_v23  ;;  %v1668_v24 = vpack.c.bf16 %v1119_v21, %v1117_v20 }
 0x20b   :  { %1595 = vmatpush1.bf16.msra.mxu1 %v1594_v28  ;;  %v930_v28 = vld [vmem:[#allocation2 + $0x480] sm:$0xff] }
 0x20c   :  { %1597 = vmatprep.subr.bf16.mxu1 %v1596_v29  ;;  %v931_v29 = vld [vmem:[#allocation2 + $0x490] sm:$0xff] }
 0x20d   :  { %v1630_v31 = vpack.c.bf16 %v931_v29, %v930_v28  ;;  %v1123_v28 = vld [vmem:[#allocation2 + $0x708] sm:$0xff] }
 0x20f   :  { %1599 = vmatpush1.bf16.msra.mxu1 %v1598_v33  ;;  %v932_v33 = vld [vmem:[#allocation2 + $0x4a0] sm:$0xff] }
 0x210   :  { %1601 = vmatprep.subr.bf16.mxu1 %v1600_v34  ;;  %v933_v34 = vld [vmem:[#allocation2 + $0x4b0] sm:$0xff] }
 0x211   :  { %v1634_v37 = vpack.c.bf16 %v933_v34, %v932_v33 }
 0x213   :  { %1603 = vmatpush1.bf16.msra.mxu1 %v1602_v39  ;;  %v934_v39 = vld [vmem:[#allocation2 + $0x4c0] sm:$0xff] }
 0x214   :  { %1605 = vmatprep.subr.bf16.mxu1 %v1604_v40  ;;  %v935_v40 = vld [vmem:[#allocation2 + $0x4d0] sm:$0xff] }
 0x215   :  { %v1638_v43 = vpack.c.bf16 %v935_v40, %v934_v39  ;;  %v1124_v40 = vld [vmem:[#allocation2 + $0x710] sm:$0xff] }
 0x216   :  { %v1678_v42 = vpack.c.bf16 %v1126_v41, %v1124_v40 }
 0x217   :  { %1607 = vmatpush1.bf16.msra.mxu1 %v1606_v45  ;;  %v936_v45 = vld [vmem:[#allocation2 + $0x4e0] sm:$0xff] }
 0x218   :  { %1609 = vmatprep.subr.bf16.mxu1 %v1608_v3  ;;  %v937_v3 = vld [vmem:[#allocation2 + $0x4f0] sm:$0xff] }
 0x219   :  { %v1642_v48 = vpack.c.bf16 %v937_v3, %v936_v45  ;;  %v1128_v3 = vld [vmem:[#allocation2 + $0x730] sm:$0xff] }
 0x21a   :  { %v1682_v47 = vpack.c.bf16 %v1130_v46, %v1128_v3 }
 0x21b   :  { %1611 = vmatpush1.bf16.msra.mxu1 %v1610_v50  ;;  %v938_v50 = vld [vmem:[#allocation2 + $0x500] sm:$0xff] }
 0x21c   :  { %1613 = vmatprep.subr.bf16.mxu1 %v1612_v52  ;;  %v939_v52 = vld [vmem:[#allocation2 + $0x510] sm:$0xff] }
 0x21d   :  { %v1646_v53 = vpack.c.bf16 %v939_v52, %v938_v50 }
 0x21f   :  { %1615 = vmatpush1.bf16.msra.mxu1 %v1614_v55  ;;  %v957_v55 = vld [vmem:[#allocation2 + $0x630] sm:$0xff] }
 0x220   :  { %1617 = vmatprep.subr.bf16.mxu1 %v1616_v5  ;;  %v1107_v5 = vld [vmem:[#allocation2 + $0x688] sm:$0xff] }
 0x221   :  { %v1656_v8 = vpack.c.bf16 %v1107_v5, %v1105_v2 }
 0x223   :  { %1619 = vmatpush1.bf16.msra.mxu1 %v1618_v9  ;;  %v1104_v9 = vld [vmem:[#allocation2 + $0x670] sm:$0xff] }
 0x224   :  { %1621 = vmatprep.subr.bf16.mxu1 %v1620_v12  ;;  %v1111_v12 = vld [vmem:[#allocation2 + $0x6a8] sm:$0xff] }
 0x2d1   :  { %v585_v56 = vpop.f32.mrb[0].mxu1 }
 0x2d2   :  { %v589_v57 = vmax.f32 %v585_v56, 0.0  ;;  %v1470_v58 = vpop.f32.mrb[1].mxu1  ;;  %v1648_v56 = vpack.c.bf16 %v957_v55, %v956_v54 }
 0x2d3   :  { %v941_v58 = vld [vmem:[#allocation2 + $0x530] sm:$0xff] }
 0x2d4   :  { %1509 = vmatmul.mubr.f32.vlgmr.msra.gmra.mrb[2].mxu0 %v589_v57  ;;  %v940_v57 = vld [vmem:[#allocation2 + $0x520] sm:$0xff] }
 0x2d5   :  { %v673_v61 = vpop.f32.mrb[2].mxu1  ;;  %1512 = vmatpush3.msra.mxu0 %v958_v59  ;;  %1513 = vmatprep.mubr.msk.f32.mxu0 %vm1758_vm0, %v1751_v1  ;;  %v1650_v59 = vpack.c.bf16 %v941_v58, %v940_v57 }
 0x2d6   :  { %v1475_v62 = vpop.f32.mrb[3].mxu1  ;;  %1134 = vmatprep.subr.mxu0 %v1133_v60  ;;  %v1101_v60 = vld [vmem:[#allocation2 + $0x658] sm:$0xff] }
 0x2d7   :  { %v1100_v62 = vld [vmem:[#allocation2 + $0x650] sm:$0xff] }
 0x2d8   :  { %1514 = vmatmul.mubr.msk.f32.vlgmr.msra.gmra.mrb[4].mxu0 %vm287_vm4, %v1825_v4  ;;  %v1654_v7 = vpack.c.bf16 %v1102_v0, %v1100_v62 }
 0x2d9   :  { %1135 = vmatpush1.msra.mxu0 %v1132_v63  ;;  %1198 = vmatprep.mubr.f32.mxu0 %v1751_v1 }
 0x2dc   :  { %1296 = vmatmul.mubr.msk.f32.vlgmr.msra.gmra.mrb[6].mxu0 %vm287_vm4, %v1825_v4 }
 0x2dd   :  { %1269 = vmatprep.mubr.f32.mxu0 %v1751_v1  ;;  %v1622_v1 = vpack.c.bf16 %v927_v13, %v926_v51  ;;  %v1658_v51 = vpack.c.bf16 %v1106_v10, %v1104_v9  ;;  %v1660_v13 = vpack.c.bf16 %v1111_v12, %v1109_v11 }
 0x3a7   :  { %v743_v14 = vpop.f32.mrb[2].mxu0 }
 0x3a8   :  { %v744_v4 = vadd.f32 %v743_v14, %v673_v61  ;;  %v1510_v17 = vpop.f32.mrb[3].mxu0  ;;  %v1103_v61 = vld [vmem:[#allocation2 + $0x668] sm:$0xff]  ;;  %v1108_v14 = vld [vmem:[#allocation2 + $0x690] sm:$0xff] }
 0x3a9   :  { %v1652_v63 = vpack.c.bf16 %v1103_v61, %v1101_v60  ;;  %v1662_v17 = vpack.c.bf16 %v1110_v15, %v1108_v14 }
 0x3aa   :  { %v747_v18 = vmax.f32 %v744_v4, 0.0  ;;  %v1115_v4 = vld [vmem:[#allocation2 + $0x6c8] sm:$0xff] }
 0x3ab   :  { %v1880_v22 = vpop.f32.mrb[4].mxu0  ;;  %1653 = vmatprep.subr.bf16.mxu0 %v1652_v63 }
 0x3ac   :  { %918 = vmatmul.mubr.f32.vlgmr.msra.gmra.mrb[4].mxu1 %v747_v18  ;;  %v1515_v25 = vpop.f32.mrb[5].mxu0  ;;  %1655 = vmatpush1.bf16.msra.mxu0 %v1654_v7  ;;  %v1112_v18 = vld [vmem:[#allocation2 + $0x6b0] sm:$0xff] }
 0x3ad   :  { %1623 = vmatpush3.bf16.msra.mxu1 %v1622_v1  ;;  %1657 = vmatprep.subr.bf16.mxu0 %v1656_v8  ;;  %v1664_v1 = vpack.c.bf16 %v1115_v4, %v1113_v16  ;;  %v1116_v25 = vld [vmem:[#allocation2 + $0x6d0] sm:$0xff] }
 0x3ae   :  { %1625 = vmatprep.subr.bf16.mxu1 %v1624_v19  ;;  %v1114_v19 = vld [vmem:[#allocation2 + $0x6c0] sm:$0xff] }
 0x3af   :  { %v1666_v23 = vpack.c.bf16 %v1114_v19, %v1112_v18 }
 0x3b0   :  { %1659 = vmatpush1.bf16.msra.mxu0 %v1658_v51 }
 0x3b1   :  { %1627 = vmatpush3.bf16.msra.mxu1 %v1626_v26  ;;  %1661 = vmatprep.subr.bf16.mxu0 %v1660_v13  ;;  %v1118_v26 = vld [vmem:[#allocation2 + $0x6e0] sm:$0xff] }
 0x3b2   :  { %1629 = vmatprep.subr.bf16.mxu1 %v1628_v27  ;;  %v1121_v27 = vld [vmem:[#allocation2 + $0x6f8] sm:$0xff]  ;;  %v1670_v29 = vpack.c.bf16 %v1118_v26, %v1116_v25 }
 0x3b3   :  { %v1672_v6 = vpack.c.bf16 %v1123_v28, %v1121_v27 }
 0x3b4   :  { %1663 = vmatpush1.bf16.msra.mxu0 %v1662_v17 }
 0x3b5   :  { %1631 = vmatpush3.bf16.msra.mxu1 %v1630_v31  ;;  %1665 = vmatprep.subr.bf16.mxu0 %v1664_v1  ;;  %v1122_v31 = vld [vmem:[#allocation2 + $0x700] sm:$0xff] }
 0x3b6   :  { %1633 = vmatprep.subr.bf16.mxu1 %v1632_v32  ;;  %v1674_v32 = vpack.c.bf16 %v1122_v31, %v1120_v30 }
 0x3b8   :  { %1667 = vmatpush1.bf16.msra.mxu0 %v1666_v23 }
 0x3b9   :  { %1635 = vmatpush3.bf16.msra.mxu1 %v1634_v37  ;;  %1669 = vmatprep.subr.bf16.mxu0 %v1668_v24  ;;  %v1125_v37 = vld [vmem:[#allocation2 + $0x718] sm:$0xff] }
 0x3ba   :  { %1637 = vmatprep.subr.bf16.mxu1 %v1636_v38  ;;  %v1127_v38 = vld [vmem:[#allocation2 + $0x728] sm:$0xff] }
 0x3bb   :  { %v1676_v39 = vpack.c.bf16 %v1127_v38, %v1125_v37 }
 0x3bc   :  { %1671 = vmatpush1.bf16.msra.mxu0 %v1670_v29 }
 0x3bd   :  { %1639 = vmatpush3.bf16.msra.mxu1 %v1638_v43  ;;  %1673 = vmatprep.subr.bf16.mxu0 %v1672_v6  ;;  %v1129_v43 = vld [vmem:[#allocation2 + $0x738] sm:$0xff] }
 0x3be   :  { %1641 = vmatprep.subr.bf16.mxu1 %v1640_v44  ;;  %v1131_v44 = vld [vmem:[#allocation2 + $0x748] sm:$0xff] }
 0x3bf   :  { %v1680_v45 = vpack.c.bf16 %v1131_v44, %v1129_v43 }
 0x3c0   :  { %1675 = vmatpush1.bf16.msra.mxu0 %v1674_v32 }
 0x3c1   :  { %1643 = vmatpush3.bf16.msra.mxu1 %v1642_v48  ;;  %1677 = vmatprep.subr.bf16.mxu0 %v1676_v39 }
 0x3c2   :  { %1645 = vmatprep.subr.bf16.mxu1 %v1644_v49 }
 0x3c4   :  { %1679 = vmatpush1.bf16.msra.mxu0 %v1678_v42 }
 0x3c5   :  { %1647 = vmatpush3.bf16.msra.mxu1 %v1646_v53  ;;  %1681 = vmatprep.subr.bf16.mxu0 %v1680_v45 }
 0x3c6   :  { %1649 = vmatprep.subr.bf16.mxu1 %v1648_v56 }
 0x3c8   :  { %1683 = vmatpush1.bf16.msra.mxu0 %v1682_v47 }
 0x3c9   :  { %1651 = vmatpush3.bf16.msra.mxu1 %v1650_v59 }
 0x47f   :  { %v919_v33 = vpop.f32.mrb[4].mxu1 }
 0x480   :  { %v921_v34 = vpop.f32.mrb[5].mxu1  ;;  %v924_v36 = vmax.f32 %v919_v33, 0.0 }
 0x481   :  { %v925_v35 = vmax.f32 %v921_v34, 0.0 }
 0x483   :  { %1093 = vmatprep.mubr.f32.mxu1 %v925_v35 }
 0x484   :  { %1094 = vmatmul.mubr.f32.vlgmr.msra.gmra.mrb[6].mxu1 %v924_v36 }
 0x557   :  { %v1388_v48 = vpop.f32.mrb[6].mxu1 }
 0x558   :  { %v1389_v49 = vpop.f32.mrb[7].mxu1 }
 0x559   :  { %v1390_v50 = vadd.f32 %v1389_v49, %v1388_v48 }
 0x55b   :  { %v1096_v52 = vadd.f32 %v1390_v50, %v1880_v22 }
 0x55d   :  { %v1099_v53 = vmax.f32 %v1096_v52, 0.0 }
 0x55f   :  { %1270 = vmatmul.mubr.f32.vlgmr.msra.gmra.mrb[6].mxu0 %v1099_v53 }
 0x632   :  { %v1271_v54 = vpop.f32.mrb[6].mxu0 }
 0x633   :  { %1276 = vst [vmem:[%s1892_s3] sm:$0xff] %v1271_v54  ;;  %v1273_v55 = vpop.f32.mrb[7].mxu0 }
 0x634   :  { %1277 = vst [vmem:[%s1892_s3 + $0x8] sm:$0xff] %v1273_v55 }
 0x635   :  { %1282 = vsyncpa [#allocation3], 1 }

</bundles_post_ra>
